<compile_context>
chip_gen: v7x
topology: tpu7x:2x2x1
jax: 0.10.0
libtpu: 0.0.40
codegen_flags: <defaults>
</compile_context>

<pallas_src>
import functools

import jax
import jax.numpy as jnp
from jax.experimental import pallas as pl
from jax.experimental.pallas import tpu as pltpu

KSIZE = 32            # conv kernel / stride
OUT_CH = 102          # conv output channels
OUT_CH_PAD = 128      # lane-aligned per-group output width
K_FLAT = KSIZE * KSIZE
TM_MAX = 1024         # max M-tile rows (~6 MiB/step double-buffered; fits v5e/v6e/v7x defaults)
MIN_GRID = 4          # aim for >= 4 grid steps on large inputs (keeps v7x's 2 TCs busy)


def _round_up(x, m):
    return ((x + m - 1) // m) * m


def _sample_matmul_kernel(p_ref, w_ref, o_ref):
    # p_ref: (TM, K)      bf16 patch tile (streamed over M)
    # w_ref: (K, G*128)   bf16 fused group weights (constant block index -> VMEM resident)
    # o_ref: (TM, G*128)  bf16 output tile (f32 accumulation inside the MXU)
    o_ref[...] = jnp.dot(p_ref[...], w_ref[...],
                         preferred_element_type=jnp.float32).astype(o_ref.dtype)


@functools.partial(jax.jit, static_argnames=("n_group",))
def sample_net_forward(img, weights, *, n_group):
    """img: [N, 1, H, W] float32; weights: [G, 102, 1, 32, 32] float32 (PyTorch conv layout)."""
    N, Cin, H, W = img.shape
    assert Cin == 1
    assert H % KSIZE == 0 and W % KSIZE == 0
    Hp, Wp = H // KSIZE, W // KSIZE
    M = N * Hp * Wp
    GC = n_group * OUT_CH_PAD                        # fused lane width (multiple of 128)

    # ---- tile sizing (static, from shapes) ----
    M_pad = _round_up(M, 16)                          # bf16 packs 2 rows/sublane -> 16-row granule
    TM = min(TM_MAX, max(16, _round_up(pl.cdiv(M_pad, MIN_GRID), 16)))
    TM = min(TM, M_pad)
    grid_m = pl.cdiv(M_pad, TM)                       # ragged last block handled by Pallas

    # ---- patch extraction (single fused XLA pass: read f32, write bf16) ----
    # [N,1,H,W] -> [M, 1024] with row-major (kh, kw) flattening (matches PyTorch weight flatten).
    patches = img.astype(jnp.bfloat16)
    patches = patches.reshape(N, Hp, KSIZE, Wp, KSIZE)
    patches = patches.transpose(0, 1, 3, 2, 4).reshape(M, K_FLAT)
    if M_pad > M:
        patches = jnp.pad(patches, ((0, M_pad - M), (0, 0)))   # <= 15 rows, fused into the pass

    # ---- fused, lane-padded weights: [G, 102, 1, 32, 32] -> [K, G*128] (bf16, ~0.5 MiB/group) ----
    w_flat = weights.reshape(n_group, OUT_CH, K_FLAT).transpose(0, 2, 1)      # [G, K, 102]
    w_flat = jnp.pad(w_flat, ((0, 0), (0, 0), (0, OUT_CH_PAD - OUT_CH)))      # [G, K, 128]
    w_fused = w_flat.transpose(1, 0, 2).reshape(K_FLAT, GC).astype(jnp.bfloat16)

    cost = pl.CostEstimate(
        flops=2 * M_pad * K_FLAT * GC,
        transcendentals=0,
        bytes_accessed=(M_pad * K_FLAT * 2) + (K_FLAT * GC * 2) + (M_pad * GC * 2),
    )

    out = pl.pallas_call(
        _sample_matmul_kernel,
        out_shape=jax.ShapeDtypeStruct((M_pad, GC), jnp.bfloat16),
        grid_spec=pltpu.PrefetchScalarGridSpec(
            num_scalar_prefetch=0,
            grid=(grid_m,),
            in_specs=[
                pl.BlockSpec((TM, K_FLAT), lambda i: (i, 0)),   # patch tile, streamed over M
                pl.BlockSpec((K_FLAT, GC), lambda i: (0, 0)),   # fused weights, VMEM-resident
            ],
            out_specs=pl.BlockSpec((TM, GC), lambda i: (i, 0)),
        ),
        compiler_params=pltpu.CompilerParams(
            dimension_semantics=("parallel",),                   # shards M-tiles across v7x's 2 TCs
        ),
        cost_estimate=cost,
    )(patches, w_fused)

    # ---- back to per-group NCHW measurements in ONE fused slice/transpose/cast pass ----
    out = out[:M].reshape(N, Hp, Wp, n_group, OUT_CH_PAD)[..., :OUT_CH]
    out = out.transpose(3, 0, 4, 1, 2).astype(jnp.float32)       # [G, N, 102, Hp, Wp]
    return [out[g] for g in range(n_group)]


def _reference_forward(img, weights, n_group):
    """Pure-JAX f32 reference of the PyTorch module (stride-32 valid conv, no bias)."""
    outs = []
    for g in range(n_group):
        out = jax.lax.conv_general_dilated(
            img, weights[g],
            window_strides=(KSIZE, KSIZE), padding="VALID",
            dimension_numbers=("NCHW", "OIHW", "NCHW"),
        )
        outs.append(out)
    return outs


if __name__ == "__main__":
    n_group = 2
    N, H, W = 2, 64, 64  # small, multiples of 32

    key = jax.random.PRNGKey(0)
    k_img, k_w = jax.random.split(key)
    img = jax.random.normal(k_img, (N, 1, H, W), dtype=jnp.float32)
    # Deterministic synthetic conv weights, PyTorch layout [G, out_ch, in_ch, kh, kw]
    weights = 0.02 * jax.random.normal(
        k_w, (n_group, OUT_CH, 1, KSIZE, KSIZE), dtype=jnp.float32)

    measurements = sample_net_forward(img, weights, n_group=n_group)
    measurements = [jax.block_until_ready(m) for m in measurements]

    refs = _reference_forward(img, weights, n_group)
    for m, r in zip(measurements, refs):
        assert m.shape == (N, OUT_CH, H // KSIZE, W // KSIZE), m.shape
        # bf16 operands + bf16 output with f32 MXU accumulation: error well under 2e-2 here.
        assert jnp.allclose(m, r, atol=2e-2, rtol=2e-2)

    print("KERNEL_OK")
</pallas_src>

<mosaic_0001>
module attributes {stable_mosaic.version = 11 : i64} {
  func.func @_sample_matmul_kernel(%arg0: i32, %arg1: memref<16x1024xbf16, #tpu.memory_space<vmem>>, %arg2: memref<1024x256xbf16, #tpu.memory_space<vmem>>, %arg3: memref<16x256xbf16, #tpu.memory_space<vmem>>) attributes {dimension_semantics = [#tpu.dimension_semantics<parallel>], iteration_bounds = array<i64: 1>, scalar_prefetch = 0 : i64, scratch_operands = 0 : i64, tpu.core_type = #tpu.core_type<tc>, window_params = [{transform_indices = @transform_0, window_bounds = array<i64: 16, 1024>}, {pipeline_mode = #tpu.pipeline_mode<synchronous>, transform_indices = @transform_1, window_bounds = array<i64: 1024, 256>}, {transform_indices = @transform_2, window_bounds = array<i64: 16, 256>}]} {
    %c0 = arith.constant 0 : index
    %c0_0 = arith.constant 0 : index
    %0 = vector.load %arg1[%c0, %c0_0] : memref<16x1024xbf16, #tpu.memory_space<vmem>>, vector<16x1024xbf16>
    %c0_1 = arith.constant 0 : index
    %c0_2 = arith.constant 0 : index
    %1 = vector.load %arg2[%c0_1, %c0_2] : memref<1024x256xbf16, #tpu.memory_space<vmem>>, vector<1024x256xbf16>
    %cst = arith.constant dense<0.000000e+00> : vector<16x256xf32>
    %2 = tpu.matmul %0, %1, %cst {dimension_numbers = #tpu.dot_dimension_numbers<[1], [0], [0], [1], [0, 0, 1, 1], [], []>} : vector<16x1024xbf16>, vector<1024x256xbf16>, vector<16x256xf32> -> vector<16x256xf32>
    %3 = arith.truncf %2 : vector<16x256xf32> to vector<16x256xbf16>
    %c0_3 = arith.constant 0 : index
    %c0_4 = arith.constant 0 : index
    %4 = vector.load %arg3[%c0_3, %c0_4] : memref<16x256xbf16, #tpu.memory_space<vmem>>, vector<16x256xbf16>
    tpu.vector_store %arg3[%c0_3, %c0_4], %3 {strides = array<i32>} : memref<16x256xbf16, #tpu.memory_space<vmem>>, vector<16x256xbf16>,
    return
  }
  func.func @transform_0(%arg0: i32) -> (i32, i32) {
    %c0_i32 = arith.constant 0 : i32
    %c0_i32_0 = arith.constant 0 : i32
    return %arg0, %c0_i32 : i32, i32
  }
  func.func @transform_1(%arg0: i32) -> (i32, i32) {
    %c0_i32 = arith.constant 0 : i32
    %c0_i32_0 = arith.constant 0 : i32
    %c0_i32_1 = arith.constant 0 : i32
    return %c0_i32, %c0_i32_0 : i32, i32
  }
  func.func @transform_2(%arg0: i32) -> (i32, i32) {
    %c0_i32 = arith.constant 0 : i32
    %c0_i32_0 = arith.constant 0 : i32
    return %arg0, %c0_i32 : i32, i32
  }
}

</mosaic_0001>

<bundles_post_ra>
// kernel: sample_net_forward.1
= control target key start
LH: loop header
LB: loop body
LE: loop exit
PB: predicated region body
PF: predicated region fallthrough
CT: control target
= control target key end

     0   :  { %s1806_s1 = inlined_call_operand.vmem [shape: bf16[1024,256], index: 1, kind: input, shape index: {}]   ;;  %s1807_s0 = inlined_call_operand.vmem [shape: bf16[16,1024], index: 0, kind: input, shape index: {}]   ;;  %s1808_s2 = inlined_call_operand.vmem [shape: bf16[16,256], index: 2, kind: output, shape index: {}]  }
   0x1   :  { %v1169_v0 = vld [vmem:[%s1806_s1 + $0x4] ss:$8 sps:$4 sm:$0xff]   ;;  %v1173_v2 = vld [vmem:[%s1806_s1] ss:$8 sps:$4 sm:$0xff]   ;;  %v1175_v4 = vld [vmem:[%s1806_s1 + $0x14] ss:$8 sps:$4 sm:$0xff]  }
   0x2   :  { %v1171_v1 = vld [vmem:[%s1806_s1 + $0x204] ss:$8 sps:$4 sm:$0xff]   ;;  %827 = vmatprep.subr.bf16.mxu1 %v1169_v0  ;;  %v1174_v3 = vld [vmem:[%s1806_s1 + $0x200] ss:$8 sps:$4 sm:$0xff]   ;;  %v1177_v5 = vld [vmem:[%s1806_s1 + $0x214] ss:$8 sps:$4 sm:$0xff]  }
   0x3   :  { %913 = vmatprep.subr.bf16.mxu0 %v1171_v1  ;;  %828 = vmatpush1.bf16.msra.mxu1 %v1173_v2  ;;  %v1179_v6 = vld [vmem:[%s1806_s1 + $0x10] ss:$8 sps:$4 sm:$0xff]   ;;  %v1181_v8 = vld [vmem:[%s1806_s1 + $0x24] ss:$8 sps:$4 sm:$0xff]   ;;  %v1185_v10 = vld [vmem:[%s1806_s1 + $0x20] ss:$8 sps:$4 sm:$0xff]  }
   0x4   :  { %914 = vmatpush1.bf16.msra.mxu0 %v1174_v3  ;;  %829 = vmatprep.subr.bf16.mxu1 %v1175_v4  ;;  %v1180_v7 = vld [vmem:[%s1806_s1 + $0x210] ss:$8 sps:$4 sm:$0xff]   ;;  %v1183_v9 = vld [vmem:[%s1806_s1 + $0x224] ss:$8 sps:$4 sm:$0xff]   ;;  %v1186_v11 = vld [vmem:[%s1806_s1 + $0x220] ss:$8 sps:$4 sm:$0xff]  }
   0x5   :  { %915 = vmatprep.subr.bf16.mxu0 %v1177_v5  ;;  %v1187_v12 = vld [vmem:[%s1806_s1 + $0x34] ss:$8 sps:$4 sm:$0xff]   ;;  %v1191_v14 = vld [vmem:[%s1806_s1 + $0x30] ss:$8 sps:$4 sm:$0xff]   ;;  %v1193_v16 = vld [vmem:[%s1806_s1 + $0x44] ss:$8 sps:$4 sm:$0xff]  }
   0x6   :  { %v1189_v13 = vld [vmem:[%s1806_s1 + $0x234] ss:$8 sps:$4 sm:$0xff]   ;;  %v1192_v15 = vld [vmem:[%s1806_s1 + $0x230] ss:$8 sps:$4 sm:$0xff]   ;;  %v1195_v17 = vld [vmem:[%s1806_s1 + $0x244] ss:$8 sps:$4 sm:$0xff]  }
   0x7   :  { %830 = vmatpush1.bf16.msra.mxu1 %v1179_v6  ;;  %v1197_v18 = vld [vmem:[%s1806_s1 + $0x40] ss:$8 sps:$4 sm:$0xff]   ;;  %v1199_v20 = vld [vmem:[%s1806_s1 + $0x54] ss:$8 sps:$4 sm:$0xff]   ;;  %v1203_v22 = vld [vmem:[%s1806_s1 + $0x50] ss:$8 sps:$4 sm:$0xff]  }
   0x8   :  { %916 = vmatpush1.bf16.msra.mxu0 %v1180_v7  ;;  %831 = vmatprep.subr.bf16.mxu1 %v1181_v8  ;;  %v1198_v19 = vld [vmem:[%s1806_s1 + $0x240] ss:$8 sps:$4 sm:$0xff]   ;;  %v1201_v21 = vld [vmem:[%s1806_s1 + $0x254] ss:$8 sps:$4 sm:$0xff]   ;;  %v1204_v23 = vld [vmem:[%s1806_s1 + $0x250] ss:$8 sps:$4 sm:$0xff]  }
   0x9   :  { %917 = vmatprep.subr.bf16.mxu0 %v1183_v9  ;;  %v1205_v24 = vld [vmem:[%s1806_s1 + $0x64] ss:$8 sps:$4 sm:$0xff]   ;;  %v1209_v26 = vld [vmem:[%s1806_s1 + $0x60] ss:$8 sps:$4 sm:$0xff]   ;;  %v1211_v28 = vld [vmem:[%s1806_s1 + $0x74] ss:$8 sps:$4 sm:$0xff]  }
   0xa   :  { %v1207_v25 = vld [vmem:[%s1806_s1 + $0x264] ss:$8 sps:$4 sm:$0xff]   ;;  %v1210_v27 = vld [vmem:[%s1806_s1 + $0x260] ss:$8 sps:$4 sm:$0xff]   ;;  %v1213_v29 = vld [vmem:[%s1806_s1 + $0x274] ss:$8 sps:$4 sm:$0xff]  }
   0xb   :  { %832 = vmatpush1.bf16.msra.mxu1 %v1185_v10  ;;  %v1215_v30 = vld [vmem:[%s1806_s1 + $0x70] ss:$8 sps:$4 sm:$0xff]   ;;  %v1217_v32 = vld [vmem:[%s1806_s1 + $0x84] ss:$8 sps:$4 sm:$0xff]   ;;  %v1221_v34 = vld [vmem:[%s1806_s1 + $0x80] ss:$8 sps:$4 sm:$0xff]  }
   0xc   :  { %918 = vmatpush1.bf16.msra.mxu0 %v1186_v11  ;;  %833 = vmatprep.subr.bf16.mxu1 %v1187_v12  ;;  %v1216_v31 = vld [vmem:[%s1806_s1 + $0x270] ss:$8 sps:$4 sm:$0xff]   ;;  %v1219_v33 = vld [vmem:[%s1806_s1 + $0x284] ss:$8 sps:$4 sm:$0xff]   ;;  %v1222_v35 = vld [vmem:[%s1806_s1 + $0x280] ss:$8 sps:$4 sm:$0xff]  }
   0xd   :  { %919 = vmatprep.subr.bf16.mxu0 %v1189_v13  ;;  %v1223_v36 = vld [vmem:[%s1806_s1 + $0x94] ss:$8 sps:$4 sm:$0xff]   ;;  %v1227_v38 = vld [vmem:[%s1806_s1 + $0x90] ss:$8 sps:$4 sm:$0xff]   ;;  %v1229_v40 = vld [vmem:[%s1806_s1 + $0xa4] ss:$8 sps:$4 sm:$0xff]  }
   0xe   :  { %v1225_v37 = vld [vmem:[%s1806_s1 + $0x294] ss:$8 sps:$4 sm:$0xff]   ;;  %v1228_v39 = vld [vmem:[%s1806_s1 + $0x290] ss:$8 sps:$4 sm:$0xff]   ;;  %v1231_v41 = vld [vmem:[%s1806_s1 + $0x2a4] ss:$8 sps:$4 sm:$0xff]  }
   0xf   :  { %834 = vmatpush1.bf16.msra.mxu1 %v1191_v14  ;;  %v1233_v42 = vld [vmem:[%s1806_s1 + $0xa0] ss:$8 sps:$4 sm:$0xff]   ;;  %v1235_v44 = vld [vmem:[%s1806_s1 + $0xb4] ss:$8 sps:$4 sm:$0xff]   ;;  %v1239_v46 = vld [vmem:[%s1806_s1 + $0xb0] ss:$8 sps:$4 sm:$0xff]  }
  0x10   :  { %920 = vmatpush1.bf16.msra.mxu0 %v1192_v15  ;;  %835 = vmatprep.subr.bf16.mxu1 %v1193_v16  ;;  %v1234_v43 = vld [vmem:[%s1806_s1 + $0x2a0] ss:$8 sps:$4 sm:$0xff]   ;;  %v1237_v45 = vld [vmem:[%s1806_s1 + $0x2b4] ss:$8 sps:$4 sm:$0xff]   ;;  %v1240_v47 = vld [vmem:[%s1806_s1 + $0x2b0] ss:$8 sps:$4 sm:$0xff]  }
  0x11   :  { %921 = vmatprep.subr.bf16.mxu0 %v1195_v17  ;;  %v11_v48 = vld [vmem:[%s1807_s0] sm:$0xff]  ;;  %v13_v53 = vld [vmem:[%s1807_s0 + $0x10] sm:$0xff] }
  0x12   :  { %v15_v49 = vld [vmem:[%s1807_s0 + $0x20] sm:$0xff]  ;;  %v17_v54 = vld [vmem:[%s1807_s0 + $0x30] sm:$0xff] }
  0x13   :  { %836 = vmatpush1.bf16.msra.mxu1 %v1197_v18  ;;  %v1241_v50 = vld [vmem:[%s1806_s1 + $0xc4] ss:$8 sps:$4 sm:$0xff]   ;;  %v1018_v52 = vcombine.high %v11_v48, %v15_v49  ;;  %v1022_v55 = vcombine.high %v13_v53, %v17_v54  ;;  %v1245_v56 = vld [vmem:[%s1806_s1 + $0xc0] ss:$8 sps:$4 sm:$0xff]   ;;  %v1247_v58 = vld [vmem:[%s1806_s1 + $0xd4] ss:$8 sps:$4 sm:$0xff]   ;;  %v1017_v8 = vcombine.low %v11_v48, %v15_v49  ;;  %v1021_v10 = vcombine.low %v13_v53, %v17_v54 }
  0x14   :  { %922 = vmatpush1.bf16.msra.mxu0 %v1198_v19  ;;  %837 = vmatprep.subr.bf16.mxu1 %v1199_v20  ;;  %v1243_v51 = vld [vmem:[%s1806_s1 + $0x2c4] ss:$8 sps:$4 sm:$0xff]   ;;  %v1246_v57 = vld [vmem:[%s1806_s1 + $0x2c0] ss:$8 sps:$4 sm:$0xff]   ;;  %v1249_v59 = vld [vmem:[%s1806_s1 + $0x2d4] ss:$8 sps:$4 sm:$0xff]  }
  0x15   :  { %923 = vmatprep.subr.bf16.mxu0 %v1201_v21  ;;  %859 = vmatprep.mubr.bf16.mxu1 %v1018_v52  ;;  %v1251_v60 = vld [vmem:[%s1806_s1 + $0xd0] ss:$8 sps:$4 sm:$0xff]   ;;  %v1253_v62 = vld [vmem:[%s1806_s1 + $0xe4] ss:$8 sps:$4 sm:$0xff]   ;;  %v1257_v0 = vld [vmem:[%s1806_s1 + $0xe0] ss:$8 sps:$4 sm:$0xff]  }
  0x16   :  { %945 = vmatprep.mubr.bf16.mxu0 %v1022_v55  ;;  %v1252_v61 = vld [vmem:[%s1806_s1 + $0x2d0] ss:$8 sps:$4 sm:$0xff]   ;;  %v1255_v63 = vld [vmem:[%s1806_s1 + $0x2e4] ss:$8 sps:$4 sm:$0xff]   ;;  %v1258_v1 = vld [vmem:[%s1806_s1 + $0x2e0] ss:$8 sps:$4 sm:$0xff]  }
  0x17   :  { %838 = vmatpush1.bf16.msra.mxu1 %v1203_v22  ;;  %v1259_v2 = vld [vmem:[%s1806_s1 + $0xf4] ss:$8 sps:$4 sm:$0xff]   ;;  %v1263_v4 = vld [vmem:[%s1806_s1 + $0xf0] ss:$8 sps:$4 sm:$0xff]   ;;  %v1267_v6 = vld [vmem:[%s1806_s1 + $0x104] ss:$8 sps:$4 sm:$0xff]  }
  0x18   :  { %924 = vmatpush1.bf16.msra.mxu0 %v1204_v23  ;;  %839 = vmatprep.subr.bf16.mxu1 %v1205_v24  ;;  %v1261_v3 = vld [vmem:[%s1806_s1 + $0x2f4] ss:$8 sps:$4 sm:$0xff]   ;;  %v1264_v5 = vld [vmem:[%s1806_s1 + $0x2f0] ss:$8 sps:$4 sm:$0xff]   ;;  %v1270_v7 = vld [vmem:[%s1806_s1 + $0x304] ss:$8 sps:$4 sm:$0xff]  }
  0x19   :  { %925 = vmatprep.subr.bf16.mxu0 %v1207_v25  ;;  %v1265_v9 = vld [vmem:[%s1806_s1 + $0x100] ss:$8 sps:$4 sm:$0xff]   ;;  %v1273_v12 = vld [vmem:[%s1806_s1 + $0x114] ss:$8 sps:$4 sm:$0xff]   ;;  %v1271_v14 = vld [vmem:[%s1806_s1 + $0x110] ss:$8 sps:$4 sm:$0xff]  }
  0x1a   :  { %v1268_v11 = vld [vmem:[%s1806_s1 + $0x300] ss:$8 sps:$4 sm:$0xff]   ;;  %v1276_v13 = vld [vmem:[%s1806_s1 + $0x314] ss:$8 sps:$4 sm:$0xff]   ;;  %v1274_v15 = vld [vmem:[%s1806_s1 + $0x310] ss:$8 sps:$4 sm:$0xff]  }
  0x1b   :  { %840 = vmatpush1.bf16.msra.mxu1 %v1209_v26  ;;  %v1279_v16 = vld [vmem:[%s1806_s1 + $0x124] ss:$8 sps:$4 sm:$0xff]   ;;  %v1277_v18 = vld [vmem:[%s1806_s1 + $0x120] ss:$8 sps:$4 sm:$0xff]   ;;  %v1285_v20 = vld [vmem:[%s1806_s1 + $0x134] ss:$8 sps:$4 sm:$0xff]  }
  0x1c   :  { %926 = vmatpush1.bf16.msra.mxu0 %v1210_v27  ;;  %841 = vmatprep.subr.bf16.mxu1 %v1211_v28  ;;  %v1282_v17 = vld [vmem:[%s1806_s1 + $0x324] ss:$8 sps:$4 sm:$0xff]   ;;  %v1280_v19 = vld [vmem:[%s1806_s1 + $0x320] ss:$8 sps:$4 sm:$0xff]   ;;  %v1288_v21 = vld [vmem:[%s1806_s1 + $0x334] ss:$8 sps:$4 sm:$0xff]  }
  0x1d   :  { %927 = vmatprep.subr.bf16.mxu0 %v1213_v29  ;;  %v1283_v22 = vld [vmem:[%s1806_s1 + $0x130] ss:$8 sps:$4 sm:$0xff]   ;;  %v1291_v24 = vld [vmem:[%s1806_s1 + $0x144] ss:$8 sps:$4 sm:$0xff]   ;;  %v1289_v26 = vld [vmem:[%s1806_s1 + $0x140] ss:$8 sps:$4 sm:$0xff]  }
  0x1e   :  { %v1286_v23 = vld [vmem:[%s1806_s1 + $0x330] ss:$8 sps:$4 sm:$0xff]   ;;  %v1294_v25 = vld [vmem:[%s1806_s1 + $0x344] ss:$8 sps:$4 sm:$0xff]   ;;  %v1292_v27 = vld [vmem:[%s1806_s1 + $0x340] ss:$8 sps:$4 sm:$0xff]  }
  0x1f   :  { %842 = vmatpush1.bf16.msra.mxu1 %v1215_v30  ;;  %v1297_v28 = vld [vmem:[%s1806_s1 + $0x154] ss:$8 sps:$4 sm:$0xff]   ;;  %v1295_v30 = vld [vmem:[%s1806_s1 + $0x150] ss:$8 sps:$4 sm:$0xff]   ;;  %v1313_v48 = vld [vmem:[%s1806_s1 + $0x180] ss:$8 sps:$4 sm:$0xff]  }
  0x20   :  { %928 = vmatpush1.bf16.msra.mxu0 %v1216_v31  ;;  %843 = vmatprep.subr.bf16.mxu1 %v1217_v32  ;;  %v1300_v29 = vld [vmem:[%s1806_s1 + $0x354] ss:$8 sps:$4 sm:$0xff]   ;;  %v1298_v31 = vld [vmem:[%s1806_s1 + $0x350] ss:$8 sps:$4 sm:$0xff]   ;;  %v1303_v32 = vld [vmem:[%s1806_s1 + $0x164] ss:$8 sps:$4 sm:$0xff]  }
  0x21   :  { %929 = vmatprep.subr.bf16.mxu0 %v1219_v33  ;;  %v1306_v33 = vld [vmem:[%s1806_s1 + $0x364] ss:$8 sps:$4 sm:$0xff]   ;;  %v1316_v49 = vld [vmem:[%s1806_s1 + $0x380] ss:$8 sps:$4 sm:$0xff]   ;;  %v1319_v52 = vld [vmem:[%s1806_s1 + $0x190] ss:$8 sps:$4 sm:$0xff]  }
  0x22   :  { %v1322_v53 = vld [vmem:[%s1806_s1 + $0x390] ss:$8 sps:$4 sm:$0xff]   ;;  %v1327_v54 = vld [vmem:[%s1806_s1 + $0x1a4] ss:$8 sps:$4 sm:$0xff]  }
  0x23   :  { %844 = vmatpush1.bf16.msra.mxu1 %v1221_v34  ;;  %v1661_v34 = vld [vmem:[%s1807_s0 + $0x8] sm:$0xff] }
  0x24   :  { %930 = vmatpush1.bf16.msra.mxu0 %v1222_v35  ;;  %845 = vmatprep.subr.bf16.mxu1 %v1223_v36  ;;  %v1666_v35 = vld [vmem:[%s1807_s0 + $0x28] sm:$0xff]  ;;  %v1671_v36 = vld [vmem:[%s1807_s0 + $0x18] sm:$0xff] }
  0x25   :  { %931 = vmatprep.subr.bf16.mxu0 %v1225_v37  ;;  %v1676_v37 = vld [vmem:[%s1807_s0 + $0x38] sm:$0xff]  ;;  %v1330_v55 = vld [vmem:[%s1806_s1 + $0x3a4] ss:$8 sps:$4 sm:$0xff]  }
  0x27   :  { %846 = vmatpush1.bf16.msra.mxu1 %v1227_v38  ;;  %v1301_v38 = vld [vmem:[%s1806_s1 + $0x160] ss:$8 sps:$4 sm:$0xff]  }
  0x28   :  { %932 = vmatpush1.bf16.msra.mxu0 %v1228_v39  ;;  %847 = vmatprep.subr.bf16.mxu1 %v1229_v40  ;;  %v1304_v39 = vld [vmem:[%s1806_s1 + $0x360] ss:$8 sps:$4 sm:$0xff]   ;;  %v1020_v40 = vcombine.high %v1661_v34, %v1666_v35 }
  0x29   :  { %933 = vmatprep.subr.bf16.mxu0 %v1231_v41  ;;  %v1309_v41 = vld [vmem:[%s1806_s1 + $0x174] ss:$8 sps:$4 sm:$0xff]  }
  0x2b   :  { %848 = vmatpush1.bf16.msra.mxu1 %v1233_v42  ;;  %v1312_v42 = vld [vmem:[%s1806_s1 + $0x374] ss:$8 sps:$4 sm:$0xff]  }
  0x2c   :  { %934 = vmatpush1.bf16.msra.mxu0 %v1234_v43  ;;  %849 = vmatprep.subr.bf16.mxu1 %v1235_v44  ;;  %v1024_v43 = vcombine.high %v1671_v36, %v1676_v37  ;;  %v1307_v44 = vld [vmem:[%s1806_s1 + $0x170] ss:$8 sps:$4 sm:$0xff]  }
  0x2d   :  { %935 = vmatprep.subr.bf16.mxu0 %v1237_v45  ;;  %v1310_v45 = vld [vmem:[%s1806_s1 + $0x370] ss:$8 sps:$4 sm:$0xff]  }
  0x2f   :  { %850 = vmatpush1.bf16.msra.mxu1 %v1239_v46  ;;  %v1315_v46 = vld [vmem:[%s1806_s1 + $0x184] ss:$8 sps:$4 sm:$0xff]  }
  0x30   :  { %936 = vmatpush1.bf16.msra.mxu0 %v1240_v47  ;;  %851 = vmatprep.subr.bf16.mxu1 %v1241_v50  ;;  %v1318_v47 = vld [vmem:[%s1806_s1 + $0x384] ss:$8 sps:$4 sm:$0xff]   ;;  %v1321_v50 = vld [vmem:[%s1806_s1 + $0x194] ss:$8 sps:$4 sm:$0xff]  }
  0x31   :  { %937 = vmatprep.subr.bf16.mxu0 %v1243_v51  ;;  %v1324_v51 = vld [vmem:[%s1806_s1 + $0x394] ss:$8 sps:$4 sm:$0xff]  }
  0x33   :  { %852 = vmatpush1.bf16.msra.mxu1 %v1245_v56  ;;  %v1325_v56 = vld [vmem:[%s1806_s1 + $0x1a0] ss:$8 sps:$4 sm:$0xff]  }
  0x34   :  { %938 = vmatpush1.bf16.msra.mxu0 %v1246_v57  ;;  %853 = vmatprep.subr.bf16.mxu1 %v1247_v58  ;;  %v1328_v57 = vld [vmem:[%s1806_s1 + $0x3a0] ss:$8 sps:$4 sm:$0xff]   ;;  %v1333_v58 = vld [vmem:[%s1806_s1 + $0x1b4] ss:$8 sps:$4 sm:$0xff]  }
  0x35   :  { %939 = vmatprep.subr.bf16.mxu0 %v1249_v59  ;;  %v1336_v59 = vld [vmem:[%s1806_s1 + $0x3b4] ss:$8 sps:$4 sm:$0xff]  }
  0x37   :  { %854 = vmatpush1.bf16.msra.mxu1 %v1251_v60  ;;  %v1331_v60 = vld [vmem:[%s1806_s1 + $0x1b0] ss:$8 sps:$4 sm:$0xff]  }
  0x38   :  { %940 = vmatpush1.bf16.msra.mxu0 %v1252_v61  ;;  %855 = vmatprep.subr.bf16.mxu1 %v1253_v62  ;;  %v1334_v61 = vld [vmem:[%s1806_s1 + $0x3b0] ss:$8 sps:$4 sm:$0xff]   ;;  %v1339_v62 = vld [vmem:[%s1806_s1 + $0x1c4] ss:$8 sps:$4 sm:$0xff]  }
  0x39   :  { %941 = vmatprep.subr.bf16.mxu0 %v1255_v63  ;;  %v1342_v63 = vld [vmem:[%s1806_s1 + $0x3c4] ss:$8 sps:$4 sm:$0xff]  }
  0x3b   :  { %856 = vmatpush1.bf16.msra.mxu1 %v1257_v0  ;;  %v1337_v0 = vld [vmem:[%s1806_s1 + $0x1c0] ss:$8 sps:$4 sm:$0xff]  }
  0x3c   :  { %942 = vmatpush1.bf16.msra.mxu0 %v1258_v1  ;;  %857 = vmatprep.subr.bf16.mxu1 %v1259_v2  ;;  %v1340_v1 = vld [vmem:[%s1806_s1 + $0x3c0] ss:$8 sps:$4 sm:$0xff]   ;;  %v1345_v2 = vld [vmem:[%s1806_s1 + $0x1d4] ss:$8 sps:$4 sm:$0xff]  }
  0x3d   :  { %943 = vmatprep.subr.bf16.mxu0 %v1261_v3  ;;  %v1348_v3 = vld [vmem:[%s1806_s1 + $0x3d4] ss:$8 sps:$4 sm:$0xff]  }
  0x3f   :  { %858 = vmatpush1.bf16.msra.mxu1 %v1263_v4  ;;  %v1343_v4 = vld [vmem:[%s1806_s1 + $0x1d0] ss:$8 sps:$4 sm:$0xff]  }
  0x40   :  { %944 = vmatpush1.bf16.msra.mxu0 %v1264_v5  ;;  %870 = vmatprep.subr.bf16.mxu1 %v1267_v6  ;;  %v1346_v5 = vld [vmem:[%s1806_s1 + $0x3d0] ss:$8 sps:$4 sm:$0xff]   ;;  %v1351_v6 = vld [vmem:[%s1806_s1 + $0x1e4] ss:$8 sps:$4 sm:$0xff]  }
  0x41   :  { %956 = vmatprep.subr.bf16.mxu0 %v1270_v7  ;;  %v1354_v7 = vld [vmem:[%s1806_s1 + $0x3e4] ss:$8 sps:$4 sm:$0xff]  }
  0x42   :  { %860 = vmatmul.mubr.bf16.vlgmr.msra.gmra.mrb[0].mxu1 %v1017_v8  ;;  %v1349_v8 = vld [vmem:[%s1806_s1 + $0x1e0] ss:$8 sps:$4 sm:$0xff]  }
  0x43   :  { %946 = vmatmul.mubr.bf16.vlgmr.msra.gmra.mrb[0].mxu0 %v1021_v10  ;;  %871 = vmatpush1.bf16.msra.mxu1 %v1265_v9  ;;  %v1352_v9 = vld [vmem:[%s1806_s1 + $0x3e0] ss:$8 sps:$4 sm:$0xff]   ;;  %v1357_v10 = vld [vmem:[%s1806_s1 + $0x1f4] ss:$8 sps:$4 sm:$0xff]  }
  0x44   :  { %957 = vmatpush1.bf16.msra.mxu0 %v1268_v11  ;;  %872 = vmatprep.subr.bf16.mxu1 %v1273_v12  ;;  %v1360_v11 = vld [vmem:[%s1806_s1 + $0x3f4] ss:$8 sps:$4 sm:$0xff]   ;;  %v1355_v12 = vld [vmem:[%s1806_s1 + $0x1f0] ss:$8 sps:$4 sm:$0xff]  }
  0x45   :  { %958 = vmatprep.subr.bf16.mxu0 %v1276_v13  ;;  %902 = vmatprep.mubr.bf16.mxu1 %v1020_v40  ;;  %v1358_v13 = vld [vmem:[%s1806_s1 + $0x3f0] ss:$8 sps:$4 sm:$0xff]  }
  0x46   :  { %988 = vmatprep.mubr.bf16.mxu0 %v1024_v43 }
  0x47   :  { %873 = vmatpush1.bf16.msra.mxu1 %v1271_v14  ;;  %v1019_v14 = vcombine.low %v1661_v34, %v1666_v35 }
  0x48   :  { %959 = vmatpush1.bf16.msra.mxu0 %v1274_v15  ;;  %874 = vmatprep.subr.bf16.mxu1 %v1279_v16  ;;  %v1023_v15 = vcombine.low %v1671_v36, %v1676_v37 }
  0x49   :  { %960 = vmatprep.subr.bf16.mxu0 %v1282_v17 }
  0x4b   :  { %875 = vmatpush1.bf16.msra.mxu1 %v1277_v18 }
  0x4c   :  { %961 = vmatpush1.bf16.msra.mxu0 %v1280_v19  ;;  %876 = vmatprep.subr.bf16.mxu1 %v1285_v20 }
  0x4d   :  { %962 = vmatprep.subr.bf16.mxu0 %v1288_v21 }
  0x4f   :  { %877 = vmatpush1.bf16.msra.mxu1 %v1283_v22 }
  0x50   :  { %963 = vmatpush1.bf16.msra.mxu0 %v1286_v23  ;;  %878 = vmatprep.subr.bf16.mxu1 %v1291_v24 }
  0x51   :  { %964 = vmatprep.subr.bf16.mxu0 %v1294_v25 }
  0x53   :  { %879 = vmatpush1.bf16.msra.mxu1 %v1289_v26 }
  0x54   :  { %965 = vmatpush1.bf16.msra.mxu0 %v1292_v27  ;;  %880 = vmatprep.subr.bf16.mxu1 %v1297_v28 }
  0x55   :  { %966 = vmatprep.subr.bf16.mxu0 %v1300_v29 }
  0x57   :  { %881 = vmatpush1.bf16.msra.mxu1 %v1295_v30 }
  0x58   :  { %967 = vmatpush1.bf16.msra.mxu0 %v1298_v31  ;;  %882 = vmatprep.subr.bf16.mxu1 %v1303_v32 }
  0x59   :  { %968 = vmatprep.subr.bf16.mxu0 %v1306_v33 }
  0x5b   :  { %883 = vmatpush1.bf16.msra.mxu1 %v1301_v38 }
  0x5c   :  { %969 = vmatpush1.bf16.msra.mxu0 %v1304_v39  ;;  %884 = vmatprep.subr.bf16.mxu1 %v1309_v41 }
  0x5d   :  { %970 = vmatprep.subr.bf16.mxu0 %v1312_v42 }
  0x5f   :  { %885 = vmatpush1.bf16.msra.mxu1 %v1307_v44 }
  0x60   :  { %971 = vmatpush1.bf16.msra.mxu0 %v1310_v45  ;;  %886 = vmatprep.subr.bf16.mxu1 %v1315_v46 }
  0x61   :  { %972 = vmatprep.subr.bf16.mxu0 %v1318_v47 }
  0x63   :  { %887 = vmatpush1.bf16.msra.mxu1 %v1313_v48 }
  0x64   :  { %973 = vmatpush1.bf16.msra.mxu0 %v1316_v49  ;;  %888 = vmatprep.subr.bf16.mxu1 %v1321_v50 }
  0x65   :  { %974 = vmatprep.subr.bf16.mxu0 %v1324_v51 }
  0x67   :  { %889 = vmatpush1.bf16.msra.mxu1 %v1319_v52 }
  0x68   :  { %975 = vmatpush1.bf16.msra.mxu0 %v1322_v53  ;;  %890 = vmatprep.subr.bf16.mxu1 %v1327_v54 }
  0x69   :  { %976 = vmatprep.subr.bf16.mxu0 %v1330_v55 }
  0x6b   :  { %891 = vmatpush1.bf16.msra.mxu1 %v1325_v56 }
  0x6c   :  { %977 = vmatpush1.bf16.msra.mxu0 %v1328_v57  ;;  %892 = vmatprep.subr.bf16.mxu1 %v1333_v58 }
  0x6d   :  { %978 = vmatprep.subr.bf16.mxu0 %v1336_v59 }
  0x6f   :  { %893 = vmatpush1.bf16.msra.mxu1 %v1331_v60 }
  0x70   :  { %979 = vmatpush1.bf16.msra.mxu0 %v1334_v61  ;;  %894 = vmatprep.subr.bf16.mxu1 %v1339_v62 }
  0x71   :  { %980 = vmatprep.subr.bf16.mxu0 %v1342_v63 }
  0x73   :  { %895 = vmatpush1.bf16.msra.mxu1 %v1337_v0 }
  0x74   :  { %981 = vmatpush1.bf16.msra.mxu0 %v1340_v1  ;;  %896 = vmatprep.subr.bf16.mxu1 %v1345_v2 }
  0x75   :  { %982 = vmatprep.subr.bf16.mxu0 %v1348_v3 }
  0x77   :  { %897 = vmatpush1.bf16.msra.mxu1 %v1343_v4 }
  0x78   :  { %983 = vmatpush1.bf16.msra.mxu0 %v1346_v5  ;;  %898 = vmatprep.subr.bf16.mxu1 %v1351_v6 }
  0x79   :  { %984 = vmatprep.subr.bf16.mxu0 %v1354_v7 }
  0x7b   :  { %899 = vmatpush1.bf16.msra.mxu1 %v1349_v8 }
  0x7c   :  { %985 = vmatpush1.bf16.msra.mxu0 %v1352_v9  ;;  %900 = vmatprep.subr.bf16.mxu1 %v1357_v10 }
  0x7d   :  { %986 = vmatprep.subr.bf16.mxu0 %v1360_v11 }
  0x7f   :  { %901 = vmatpush1.bf16.msra.mxu1 %v1355_v12 }
  0x80   :  { %987 = vmatpush1.bf16.msra.mxu0 %v1358_v13 }
  0x82   :  { %903 = vmatmul.mubr.bf16.vlgmr.msra.gmra.mrb[0].mxu1 %v1019_v14 }
  0x83   :  { %989 = vmatmul.mubr.bf16.vlgmr.msra.gmra.mrb[0].mxu0 %v1023_v15 }
 0x155   :  { %v904_v16 = vpop.f32.mrb[0].mxu1 }
 0x156   :  { %v990_v17 = vpop.f32.mrb[0].mxu0  ;;  %v906_v19 = vpop.f32.mrb[1].mxu1 }
 0x157   :  { %v1157_v18 = vadd.f32 %v990_v17, %v904_v16  ;;  %v992_v20 = vpop.f32.mrb[1].mxu0  ;;  %v908_v22 = vpop.f32.mrb[2].mxu1 }
 0x158   :  { %v1158_v21 = vadd.f32 %v992_v20, %v906_v19  ;;  %v994_v23 = vpop.f32.mrb[2].mxu0  ;;  %v910_v25 = vpop.f32.mrb[3].mxu1 }
 0x159   :  { %v1159_v24 = vadd.f32 %v994_v23, %v908_v22  ;;  %v996_v26 = vpop.f32.mrb[3].mxu0 }
 0x15a   :  { %v1155_v27 = vpack.c.bf16 %v1158_v21, %v1157_v18  ;;  %v1160_v28 = vadd.f32 %v996_v26, %v910_v25 }
 0x15c   :  { %1011 = vst [vmem:[%s1808_s2] sm:$0xff] %v1155_v27  ;;  %v1156_v29 = vpack.c.bf16 %v1160_v28, %v1159_v24 }
 0x15e   :  { %1012 = vst [vmem:[%s1808_s2 + $0x8] sm:$0xff] %v1156_v29 }

</bundles_post_ra>
